<compile_context>
chip_gen: v5e
topology: v5e:2x2
jax: 0.10.0
libtpu: 0.0.40
codegen_flags: <defaults>
</compile_context>

<pallas_src>
import functools

import jax
import jax.numpy as jnp
from jax.experimental import pallas as pl
from jax.experimental.pallas import tpu as pltpu


def _round_up(n, m):
    return ((n + m - 1) // m) * m


def _bnn_linear_kernel(x_ref, w_ref, ind_ref, b_ref, o_ref, *, use_mxu):
    # Exact f32 elementwise product on the VPU; w_ref is the sampled weight
    # vector tiled across the packed lane groups, broadcast over the batch rows.
    xw = x_ref[...].astype(jnp.float32) * w_ref[...]
    if use_mxu:
        # Group-sum on the otherwise-idle MXU: (tb, g*F) @ (g*F, g) against an
        # exact 0/1 indicator. Two native bf16 passes (hi + lo split of the f32
        # product) with f32 accumulation give ~f32 accuracy.
        hi = xw.astype(jnp.bfloat16)
        lo = (xw - hi.astype(jnp.float32)).astype(jnp.bfloat16)
        ind = ind_ref[...]
        acc = jnp.dot(hi, ind, preferred_element_type=jnp.float32)
        acc = acc + jnp.dot(lo, ind, preferred_element_type=jnp.float32)
    else:
        # Fallback (F does not pack into 128 lanes): exact f32 lane reduce.
        acc = jnp.sum(xw, axis=-1, keepdims=True)
    o_ref[...] = (acc + b_ref[0]).astype(o_ref.dtype)


@functools.partial(jax.jit, static_argnames=("block_rows",))
def shallow_bnn_forward(x, w_mu, w_log_sigma, eps_w, b_mu, b_log_sigma, eps_b,
                        *, block_rows=None):
    """x: [B, F]; w_*: [1, F] (or [F]); b_*/eps_b scalar-shaped. Returns [B, 1] f32."""
    B, F = x.shape

    # ---- tiny wrapper-side work: sample W and b once (F elems + 1 scalar) ----
    w = (jnp.reshape(w_mu, (F,)).astype(jnp.float32)
         + jnp.exp(jnp.reshape(w_log_sigma, (F,)).astype(jnp.float32))
         * jnp.reshape(eps_w, (F,)).astype(jnp.float32))
    bias = (jnp.reshape(b_mu, ()).astype(jnp.float32)
            + jnp.exp(jnp.reshape(b_log_sigma, ()).astype(jnp.float32))
            * jnp.reshape(eps_b, ()).astype(jnp.float32)).reshape((1,))

    # Stream x as-is (f32 or caller-provided bf16); only other dtypes are cast.
    if x.dtype not in (jnp.float32, jnp.bfloat16):
        x = x.astype(jnp.float32)

    # ---- lane packing: g rows per 128-lane vreg row (free contiguous reshape) --
    g = 128 // F if (F <= 128 and 128 % F == 0 and (128 // F) > 1
                     and B % (128 // F) == 0) else 1
    bp, fp = B // g, F * g
    xp = x.reshape(bp, fp)

    w_tiled = jnp.tile(jnp.reshape(w, (1, F)), (1, g))                        # (1, fp) f32
    # Exact 0/1 group indicator: ind[i, j] = 1 iff i // F == j (exact in bf16).
    ind = (jnp.arange(fp, dtype=jnp.int32)[:, None] // F
           == jnp.arange(g, dtype=jnp.int32)[None, :]).astype(jnp.bfloat16)  # (fp, g)

    # ---- tile size: ~4 MiB x-blocks (>=512 KiB), ~>=8 grid steps at large B ----
    bytes_per_row = fp * xp.dtype.itemsize
    if block_rows is None:
        target = max(8, (4 * 1024 * 1024) // bytes_per_row)
        floor_rows = max(8, (512 * 1024) // bytes_per_row)
        tb = min(target, max(floor_rows, pl.cdiv(bp, 8)))
    else:
        tb = int(block_rows)
    if tb >= bp:
        tb = bp                        # single full-height block (any size legal)
    else:
        tb = max(8, (tb // 8) * 8)     # partial blocks must be sublane-aligned
    grid = (pl.cdiv(bp, tb),)          # boundary block may overhang; extra rows
                                       # are row-local garbage, dropped on writeback

    out = pl.pallas_call(
        functools.partial(_bnn_linear_kernel, use_mxu=(g > 1)),
        out_shape=jax.ShapeDtypeStruct((bp, g), jnp.float32),
        grid=grid,
        in_specs=[
            pl.BlockSpec((tb, fp), lambda i: (i, 0)),            # x: tiled over batch
            pl.BlockSpec((1, fp), lambda i: (0, 0)),             # sampled w (resident)
            pl.BlockSpec((fp, g), lambda i: (0, 0)),             # indicator (resident)
            pl.BlockSpec(memory_space=pltpu.MemorySpace.SMEM),   # bias scalar
        ],
        out_specs=pl.BlockSpec((tb, g), lambda i: (i, 0)),
        compiler_params=pltpu.CompilerParams(
            dimension_semantics=("parallel",),                   # 2-TC sharding on v7x
        ),
    )(xp, w_tiled, ind, bias)

    # (bp, g) row-major == original row order; free reshape back to [B, 1].
    return out.reshape(B, 1)


if __name__ == "__main__":
    key = jax.random.PRNGKey(0)
    kx1, kx2, kx3, kwm, kws, kew, kbm, kbs, keb = jax.random.split(key, 9)

    F = 32   # n_features

    # BayesLinear(in=F, out=1, bias=True) parameters + reparameterization noise.
    w_mu = jax.random.normal(kwm, (1, F), dtype=jnp.float32) * 0.1
    w_log_sigma = jnp.full((1, F), -3.0, jnp.float32) \
        + 0.01 * jax.random.normal(kws, (1, F), dtype=jnp.float32)
    eps_w = jax.random.normal(kew, (1, F), dtype=jnp.float32)
    b_mu = jax.random.normal(kbm, (1, 1), dtype=jnp.float32) * 0.1
    b_log_sigma = jnp.full((1, 1), -3.0, jnp.float32) \
        + 0.01 * jax.random.normal(kbs, (1, 1), dtype=jnp.float32)
    eps_b = jax.random.normal(keb, (1, 1), dtype=jnp.float32)

    def reference(xv):
        w_s = w_mu + jnp.exp(w_log_sigma) * eps_w            # [1, F]
        b_s = b_mu + jnp.exp(b_log_sigma) * eps_b            # [1, 1]
        # Pure elementwise f32 reference (no matmul-precision ambiguity).
        return jnp.sum(xv.astype(jnp.float32) * w_s, axis=-1, keepdims=True) + b_s

    # Case 1: small batch, single block.
    x1 = jax.random.normal(kx1, (32, F), dtype=jnp.float32)
    out1 = jax.block_until_ready(
        shallow_bnn_forward(x1, w_mu, w_log_sigma, eps_w, b_mu, b_log_sigma, eps_b))
    assert out1.shape == (32, 1)
    assert jnp.allclose(out1, reference(x1), atol=1e-4), "mismatch (case 1)"

    # Case 2: packed row count (260/4 = 65) not a multiple of 8 -> full-height
    # block, no wrapper padding pass.
    x2 = jax.random.normal(kx2, (260, F), dtype=jnp.float32)
    out2 = jax.block_until_ready(
        shallow_bnn_forward(x2, w_mu, w_log_sigma, eps_w, b_mu, b_log_sigma, eps_b))
    assert out2.shape == (260, 1)
    assert jnp.allclose(out2, reference(x2), atol=1e-4), "mismatch (case 2)"

    # Case 3: multi-step grid (9 steps) with a partially out-of-bounds last block.
    x3 = jax.random.normal(kx3, (2052, F), dtype=jnp.float32)
    out3 = jax.block_until_ready(
        shallow_bnn_forward(x3, w_mu, w_log_sigma, eps_w, b_mu, b_log_sigma, eps_b,
                            block_rows=64))
    assert out3.shape == (2052, 1)
    assert jnp.allclose(out3, reference(x3), atol=1e-4), "mismatch (case 3)"

    print("KERNEL_OK")
</pallas_src>

<mosaic_0001>
module attributes {stable_mosaic.version = 11 : i64} {
  func.func @_bnn_linear_kernel(%arg0: i32, %arg1: memref<8x128xf32, #tpu.memory_space<vmem>>, %arg2: memref<1x128xf32, #tpu.memory_space<vmem>>, %arg3: memref<128x4xbf16, #tpu.memory_space<vmem>>, %arg4: memref<1xf32, #tpu.memory_space<smem>>, %arg5: memref<8x4xf32, #tpu.memory_space<vmem>>) attributes {dimension_semantics = [#tpu.dimension_semantics<parallel>], iteration_bounds = array<i64: 1>, scalar_prefetch = 0 : i64, scratch_operands = 0 : i64, tpu.core_type = #tpu.core_type<tc>, window_params = [{transform_indices = @transform_0, window_bounds = array<i64: 8, 128>}, {pipeline_mode = #tpu.pipeline_mode<synchronous>, transform_indices = @transform_1, window_bounds = array<i64: 1, 128>}, {pipeline_mode = #tpu.pipeline_mode<synchronous>, transform_indices = @transform_2, window_bounds = array<i64: 128, 4>}, {transform_indices = @transform_3, window_bounds = array<i64: 1>}, {transform_indices = @transform_4, window_bounds = array<i64: 8, 4>}]} {
    %c0 = arith.constant 0 : index
    %c0_0 = arith.constant 0 : index
    %0 = vector.load %arg1[%c0, %c0_0] : memref<8x128xf32, #tpu.memory_space<vmem>>, vector<8x128xf32>
    %c0_1 = arith.constant 0 : index
    %c0_2 = arith.constant 0 : index
    %1 = vector.load %arg2[%c0_1, %c0_2] : memref<1x128xf32, #tpu.memory_space<vmem>>, vector<1x128xf32>
    %2 = vector.broadcast %1 : vector<1x128xf32> to vector<8x128xf32>
    %3 = arith.mulf %0, %2 : vector<8x128xf32>
    %4 = arith.truncf %3 : vector<8x128xf32> to vector<8x128xbf16>
    %5 = arith.extf %4 : vector<8x128xbf16> to vector<8x128xf32>
    %6 = arith.subf %3, %5 : vector<8x128xf32>
    %7 = arith.truncf %6 : vector<8x128xf32> to vector<8x128xbf16>
    %c0_3 = arith.constant 0 : index
    %c0_4 = arith.constant 0 : index
    %8 = vector.load %arg3[%c0_3, %c0_4] : memref<128x4xbf16, #tpu.memory_space<vmem>>, vector<128x4xbf16>
    %cst = arith.constant dense<0.000000e+00> : vector<8x4xf32>
    %9 = tpu.matmul %4, %8, %cst {dimension_numbers = #tpu.dot_dimension_numbers<[1], [0], [0], [1], [0, 0, 1, 1], [], []>} : vector<8x128xbf16>, vector<128x4xbf16>, vector<8x4xf32> -> vector<8x4xf32>
    %cst_5 = arith.constant dense<0.000000e+00> : vector<8x4xf32>
    %10 = tpu.matmul %7, %8, %cst_5 {dimension_numbers = #tpu.dot_dimension_numbers<[1], [0], [0], [1], [0, 0, 1, 1], [], []>} : vector<8x128xbf16>, vector<128x4xbf16>, vector<8x4xf32> -> vector<8x4xf32>
    %11 = arith.addf %9, %10 : vector<8x4xf32>
    %c0_6 = arith.constant 0 : index
    %12 = memref.load %arg4[%c0_6] : memref<1xf32, #tpu.memory_space<smem>>
    %13 = vector.broadcast %12 : f32 to vector<8x4xf32>
    %14 = arith.addf %11, %13 : vector<8x4xf32>
    %c0_7 = arith.constant 0 : index
    %c0_8 = arith.constant 0 : index
    %15 = vector.load %arg5[%c0_7, %c0_8] : memref<8x4xf32, #tpu.memory_space<vmem>>, vector<8x4xf32>
    tpu.vector_store %arg5[%c0_7, %c0_8], %14 {strides = array<i32>} : memref<8x4xf32, #tpu.memory_space<vmem>>, vector<8x4xf32>,
    return
  }
  func.func @transform_0(%arg0: i32) -> (i32, i32) {
    %c0_i32 = arith.constant 0 : i32
    %c0_i32_0 = arith.constant 0 : i32
    return %arg0, %c0_i32 : i32, i32
  }
  func.func @transform_1(%arg0: i32) -> (i32, i32) {
    %c0_i32 = arith.constant 0 : i32
    %c0_i32_0 = arith.constant 0 : i32
    %c0_i32_1 = arith.constant 0 : i32
    return %c0_i32, %c0_i32_0 : i32, i32
  }
  func.func @transform_2(%arg0: i32) -> (i32, i32) {
    %c0_i32 = arith.constant 0 : i32
    %c0_i32_0 = arith.constant 0 : i32
    %c0_i32_1 = arith.constant 0 : i32
    return %c0_i32, %c0_i32_0 : i32, i32
  }
  func.func @transform_3(%arg0: i32) -> i32 {
    %c0_i32 = arith.constant 0 : i32
    %c0_i32_0 = arith.constant 0 : i32
    return %c0_i32 : i32
  }
  func.func @transform_4(%arg0: i32) -> (i32, i32) {
    %c0_i32 = arith.constant 0 : i32
    %c0_i32_0 = arith.constant 0 : i32
    return %arg0, %c0_i32 : i32, i32
  }
}

</mosaic_0001>

<bundles_post_ra>
// kernel: shallow_bnn_forward.1
= control target key start
LH: loop header
LB: loop body
LE: loop exit
PB: predicated region body
PF: predicated region fallthrough
CT: control target
= control target key end

     0   :  { %vm121_vm0 = vcmask 31744   ;;  %s229_s2 = inlined_call_operand.vmem [shape: bf16[128,4], index: 2, kind: input, shape index: {}]   ;;  %s230_s1 = inlined_call_operand.vmem [shape: f32[1,128], index: 1, kind: input, shape index: {}]   ;;  %s231_s0 = inlined_call_operand.vmem [shape: f32[8,128], index: 0, kind: input, shape index: {}]   ;;  %s232_s3 = inlined_call_operand.<no memory space> [shape: f32[1], index: 3, kind: input, shape index: {}]   ;;  %s233_s4 = inlined_call_operand.vmem [shape: f32[8,4], index: 4, kind: output, shape index: {}]  }
   0x1   :  { %v166_v0 = vld [vmem:[%s229_s2 + $0x38] sm:$0xff]  ;;  %v165_v1 = vld [vmem:[%s229_s2 + $0x30] sm:$0xff]  ;;  %v164_v2 = vld [vmem:[%s229_s2 + $0x28] sm:$0xff]  ;;  %v119_v17 = vstv %s232_s3 }
   0x2   :  { %92 = vmatpush.bf16.msra.mxu0 %v166_v0  ;;  %105 = vmatpush.bf16.msra.mxu1 %v166_v0  ;;  %v167_v3 = vld [vmem:[%s230_s1] ss:$0 sm:$0xff]  ;;  %v162_v7 = vld [vmem:[%s229_s2 + $0x18] sm:$0xff]  ;;  %v161_v9 = vld [vmem:[%s229_s2 + $0x10] sm:$0xff] }
   0x3   :  { %v163_v4 = vld [vmem:[%s229_s2 + $0x20] sm:$0xff]  ;;  %v160_v11 = vld [vmem:[%s229_s2 + $0x8] sm:$0xff] }
   0x4   :  { %v18_v5 = vld [vmem:[%s231_s0] sm:$0xff] }
   0x5   :  { %v23_v6 = vmul.f32 %v167_v3, %v18_v5  ;;  %v159_v13 = vld [vmem:[%s229_s2] sm:$0xff] }
   0x6   :  { %93 = vmatpush.bf16.msra.mxu0 %v165_v1  ;;  %106 = vmatpush.bf16.msra.mxu1 %v165_v1 }
   0x7   :  { %v24_v8 = vpack.c.bf16 %v23_v6, %v23_v6 }
   0x9   :  { %v25_v10 = vunpack.c.l.bf16 %v24_v8 }
   0xa   :  { %94 = vmatpush.bf16.msra.mxu0 %v164_v2  ;;  %107 = vmatpush.bf16.msra.mxu1 %v164_v2 }
   0xb   :  { %v26_v12 = vsub.f32 %v23_v6, %v25_v10 }
   0xd   :  { %v27_v14 = vpack.c.bf16 %v26_v12, %v26_v12 }
   0xe   :  { %95 = vmatpush.bf16.msra.mxu0 %v163_v4  ;;  %108 = vmatpush.bf16.msra.mxu1 %v163_v4 }
  0x12   :  { %96 = vmatpush.bf16.msra.mxu0 %v162_v7  ;;  %109 = vmatpush.bf16.msra.mxu1 %v162_v7 }
  0x16   :  { %97 = vmatpush.bf16.msra.mxu0 %v161_v9  ;;  %110 = vmatpush.bf16.msra.mxu1 %v161_v9 }
  0x1a   :  { %98 = vmatpush.bf16.msra.mxu0 %v160_v11  ;;  %111 = vmatpush.bf16.msra.mxu1 %v160_v11 }
  0x1e   :  { %99 = vmatpush.bf16.msra.mxu0 %v159_v13  ;;  %112 = vmatpush.bf16.msra.mxu1 %v159_v13 }
  0x21   :  { %100 = vmatmul.bf16.vlgmr.msra.gmra.mxu0 %v27_v14  ;;  %113 = vmatmul.bf16.vlgmr.msra.gmra.mxu1 %v24_v8 }
  0x9e   :  { %v101_v15 = vpop.f32.mrf.mxu0  ;;  %v114_v16 = vpop.f32.mrf.mxu1 }
  0x9f   :  { %v115_v18 = vadd.f32 %v114_v16, %v101_v15 }
  0xa1   :  { %v120_v19 = vadd.f32 %v119_v17, %v115_v18 }
  0xa3   :  { %122 = vst.msk [vmem:[%s233_s4] sm:$0xff] %vm121_vm0, %v120_v19 }
  0xa6   :  { %v103_v20 = vpop.f32.mrf.mxu0  ;;  %v116_v21 = vpop.f32.mrf.mxu1 }

</bundles_post_ra>
